<compile_context>
chip_gen: v7x
topology: tpu7x:2x2x1
jax: 0.10.0
libtpu: 0.0.40
codegen_flags: <defaults>
</compile_context>

<pallas_src>
import functools

import numpy as np
import jax
import jax.numpy as jnp
from jax import lax
from jax.experimental import pallas as pl
from jax.experimental.pallas import tpu as pltpu


# ----------------------------------------------------------------------------
# Parameter setup (deterministic, mirrors truncated_gaussian_in_full_window).
# ----------------------------------------------------------------------------
def make_smoothing_filter(full_window_size=20, trunc_window_size=9, sigma=4.0):
    trunc_half = trunc_window_size // 2
    x = np.arange(-trunc_half, trunc_half + 1, dtype=np.float32)
    g = np.exp(-0.5 * (x / np.float32(sigma)) ** 2).astype(np.float32)
    g = g / g.sum()
    f = np.zeros(full_window_size, dtype=np.float32)
    c = full_window_size // 2
    f[c - trunc_half:c + trunc_half + 1] = g
    return f


def make_conv_same_matrix(filt):
    """Matrix M with (M @ w)[t] == conv1d(w, filt, padding='same')[t].

    PyTorch pads asymmetrically for even kernels: left = (W-1)//2, and conv1d
    is a cross-correlation: out[t] = sum_k filt[k] * w[t + k - left].
    """
    W = filt.shape[0]
    pad_left = (W - 1) // 2
    M = np.zeros((W, W), dtype=np.float32)
    for t in range(W):
        for s in range(W):
            k = s - t + pad_left
            if 0 <= k < W:
                M[t, s] = filt[k]
    return M


# ----------------------------------------------------------------------------
# Pallas kernel: one grid step per utterance, per-utterance partial loss out.
# ----------------------------------------------------------------------------
def smp_kernel(tau_s_ref, wlen_ref, tgt_ref, pnum_ref, first_ref, last_ref,
               flen_ref, x_ref, wconv_t_ref, out_ref, *, sil_idx):
    b = pl.program_id(0)
    T = x_ref.shape[1]
    C = x_ref.shape[2]
    wconv_t = wconv_t_ref[...]            # (W, W) transposed "same"-conv matrix, loaded once
    W = wconv_t.shape[0]

    pnum = pnum_ref[b]
    flen = flen_ref[b]

    # Small constants hoisted out of the phoneme loop.
    d_iota = lax.broadcasted_iota(jnp.int32, (W, 1), 0)   # window position (sublane)
    w_iota = lax.broadcasted_iota(jnp.int32, (1, W), 1)   # window position (lane)
    c_iota = lax.broadcasted_iota(jnp.int32, (1, C), 1)   # class index (lane)
    neg_inf = jnp.float32(-jnp.inf)
    zero = jnp.float32(0.0)

    def phon_body(idx, acc):
        start = tau_s_ref[b, idx]          # window start (wrapper-clamped in-bounds)
        L = wlen_ref[b, idx]               # valid window length (<= W)
        cls = tgt_ref[b, idx]              # target class for this phoneme

        win = x_ref[0, pl.ds(start, W), :]                    # (W, C) dynamic slice
        col = jnp.sum(jnp.where(c_iota == cls, win, zero),
                      axis=-1, keepdims=True)                 # (W, 1) target-class column
        col = jnp.where(d_iota < L, col, zero)                # zero past window end
        # conv1d(..., padding='same'): smooth[t] = sum_s wconv[t, s] * col[s]
        smooth = jnp.sum(wconv_t * col, axis=0, keepdims=True)  # (1, W)
        mx = jnp.max(jnp.where(w_iota < L, smooth, neg_inf))
        return acc + jnp.where(L > 0, -mx, zero)              # guard empty windows

    # Only loop over the real phonemes; ragged padding is skipped entirely.
    phon_loss = lax.fori_loop(0, pnum, phon_body, jnp.float32(0.0))

    # Silence terms: -sum X[:first_start, sil] - sum X[last_end:flen, sil],
    # computed on the sil_idx column only (static lane slice).
    x_sil = x_ref[0, :, sil_idx:sil_idx + 1]                  # (T, 1)
    t_iota = lax.broadcasted_iota(jnp.int32, (T, 1), 0)
    first_start = first_ref[b]
    last_end = last_ref[b]
    sil_mask = (t_iota < first_start) | ((t_iota >= last_end) & (t_iota < flen))
    sil_sum = jnp.sum(jnp.where(sil_mask, x_sil, zero))

    total = phon_loss - sil_sum
    out_ref[...] = jnp.broadcast_to(total, out_ref.shape)     # lane-dense partial write


# ----------------------------------------------------------------------------
# Wrapper (glue: schedule computation + pallas_call).
# ----------------------------------------------------------------------------
def encoder_smp_loss(X, lengths, tgt_list, p_end, *, win_size=20, offset_d=40,
                     trunc_window_size=9, sigma=4, sil_idx=0):
    X = jnp.asarray(X, jnp.float32)
    B, T, C = X.shape

    # Pad the frame axis so a win_size-long dynamic slice is always in-bounds
    # (VMEM refs have no runtime bounds check).
    T_pad = max(T, win_size)
    if T_pad != T:
        X = jnp.pad(X, ((0, 0), (0, T_pad - T), (0, 0)))

    lengths = jnp.minimum(jnp.asarray(lengths, jnp.int32), T)
    pnums = jnp.asarray([len(t) for t in tgt_list], jnp.int32)
    Pmax = int(max(len(t) for t in tgt_list))

    tgt_pad_np = np.zeros((B, Pmax), dtype=np.int32)
    for i, t in enumerate(tgt_list):
        tgt_pad_np[i, :len(t)] = np.asarray(t, dtype=np.int32)
    tgt_pad = jnp.asarray(tgt_pad_np)

    p_end_arr = jnp.asarray(p_end, jnp.int32)
    phoneme_ends = jnp.minimum(p_end_arr + offset_d, lengths)
    idxs = jnp.arange(Pmax, dtype=jnp.int32)[None, :]
    tau_s = jnp.maximum(phoneme_ends[:, None] - win_size * (pnums[:, None] - idxs), 0)
    tau_e = jnp.minimum(tau_s + win_size, lengths[:, None])
    wlens = (tau_e - tau_s).astype(jnp.int32)
    firsts = tau_s[:, 0].astype(jnp.int32)
    lasts = tau_e[jnp.arange(B), pnums - 1].astype(jnp.int32)

    # For valid slots tau_s + win_size <= length <= T_pad already holds; the
    # clip is a pure safety net so pl.ds(start, win_size) can never go OOB.
    tau_s_slice = jnp.clip(tau_s, 0, T_pad - win_size).astype(jnp.int32)

    filt = make_smoothing_filter(win_size, trunc_window_size, float(sigma))
    wconv_t = jnp.asarray(np.ascontiguousarray(make_conv_same_matrix(filt).T))

    kernel = functools.partial(smp_kernel, sil_idx=sil_idx)

    # Explicit VMEM budget: double-buffered X block + conv matrix + output
    # block (lane/sublane padded) + margin.
    # TODO(synk): tile the frame axis if T*C ever outgrows this budget.
    def _rup(v, m):
        return (v + m - 1) // m * m
    x_blk = _rup(T_pad, 8) * _rup(C, 128) * 4
    w_blk = _rup(win_size, 8) * _rup(win_size, 128) * 4
    o_blk = 8 * 128 * 4
    vmem_limit = int(min(48 * 1024 * 1024,
                         max(2 * (x_blk + w_blk + o_blk) + (2 << 20), 8 << 20)))

    out = pl.pallas_call(
        kernel,
        out_shape=jax.ShapeDtypeStruct((B, 8, 128), jnp.float32),
        grid_spec=pltpu.PrefetchScalarGridSpec(
            num_scalar_prefetch=7,
            grid=(B,),
            in_specs=[
                pl.BlockSpec((1, T_pad, C), lambda b, *_: (b, 0, 0)),      # X
                pl.BlockSpec((win_size, win_size), lambda b, *_: (0, 0)),  # conv matrix^T
            ],
            out_specs=pl.BlockSpec((1, 8, 128), lambda b, *_: (b, 0, 0)),
        ),
        compiler_params=pltpu.CompilerParams(
            dimension_semantics=("parallel",),
            vmem_limit_bytes=vmem_limit),
    )(tau_s_slice, wlens, tgt_pad, pnums, firsts, lasts, lengths,
      X, wconv_t)
    # Per-utterance partials live in out[:, 0, 0]; reduce in the wrapper so the
    # batch grid axis stays fully parallel (both TensorCores on v7x).
    return jnp.sum(out[:, 0, 0])


# ----------------------------------------------------------------------------
# Pure-numpy reference mirroring the PyTorch forward (for self-check).
# ----------------------------------------------------------------------------
def reference_loss(X, lengths, tgt, p_end, win_size=20, offset_d=40,
                   trunc_window_size=9, sigma=4, sil_idx=0):
    X = np.asarray(X, np.float32)
    lengths = np.asarray(lengths)
    filt = make_smoothing_filter(win_size, trunc_window_size, float(sigma))
    B = X.shape[0]
    pnums = np.array([len(t) for t in tgt])
    pends = np.minimum(np.asarray(p_end) + offset_d, lengths)
    Pmax = pnums.max()
    idxs = np.arange(Pmax)
    tau_s = np.maximum(pends[:, None] - win_size * (pnums[:, None] - idxs[None, :]), 0)
    tau_e = np.minimum(tau_s + win_size, lengths[:, None])
    pad_l = (win_size - 1) // 2
    pad_r = win_size - 1 - pad_l
    loss = 0.0
    for i in range(B):
        fl = int(lengths[i])
        for idx in range(int(pnums[i])):
            s, e = int(tau_s[i, idx]), int(tau_e[i, idx])
            w = X[i, s:e, tgt[i][idx]]
            L = e - s
            padded = np.concatenate(
                [np.zeros(pad_l, np.float32), w, np.zeros(pad_r, np.float32)])
            out = np.array([np.dot(filt, padded[t:t + win_size]) for t in range(L)])
            loss += -out.max()
        loss += -X[i, :int(tau_s[i, 0]), sil_idx].sum()
        loss += -X[i, int(tau_e[i, pnums[i] - 1]):fl, sil_idx].sum()
    return float(loss)


if __name__ == "__main__":
    key = jax.random.PRNGKey(0)
    B, T, C = 2, 64, 8
    logits = jax.random.normal(key, (B, T, C), dtype=jnp.float32)
    X = jax.nn.log_softmax(logits, axis=-1)

    lengths = [64, 15]           # encoder lengths per utterance
    tgt = [[1, 2, 3], [4, 5]]    # ragged per-utterance phoneme label lists
    p_end = [22, 2]              # per-utterance phoneme end frame

    loss = encoder_smp_loss(X, lengths, tgt, p_end)
    loss = jax.block_until_ready(loss)

    ref = reference_loss(np.asarray(X), lengths, tgt, p_end)
    assert abs(float(loss) - ref) <= 1e-3 * max(1.0, abs(ref)), (float(loss), ref)
    print("KERNEL_OK")
</pallas_src>

<mosaic_0001>
module attributes {stable_mosaic.version = 11 : i64} {
  func.func @smp_kernel(%arg0: i32, %arg1: memref<2x3xi32, #tpu.memory_space<smem>>, %arg2: memref<2x3xi32, #tpu.memory_space<smem>>, %arg3: memref<2x3xi32, #tpu.memory_space<smem>>, %arg4: memref<2xi32, #tpu.memory_space<smem>>, %arg5: memref<2xi32, #tpu.memory_space<smem>>, %arg6: memref<2xi32, #tpu.memory_space<smem>>, %arg7: memref<2xi32, #tpu.memory_space<smem>>, %arg8: memref<1x64x8xf32, #tpu.memory_space<vmem>>, %arg9: memref<20x20xf32, #tpu.memory_space<vmem>>, %arg10: memref<1x8x128xf32, #tpu.memory_space<vmem>>) attributes {dimension_semantics = [#tpu.dimension_semantics<parallel>], iteration_bounds = array<i64: 2>, scalar_prefetch = 7 : i64, scratch_operands = 0 : i64, tpu.core_type = #tpu.core_type<tc>, window_params = [{transform_indices = @transform_0, window_bounds = array<i64: 1, 64, 8>}, {pipeline_mode = #tpu.pipeline_mode<synchronous>, transform_indices = @transform_1, window_bounds = array<i64: 20, 20>}, {transform_indices = @transform_2, window_bounds = array<i64: 1, 8, 128>}]} {
    %c0 = arith.constant 0 : index
    %c0_0 = arith.constant 0 : index
    %0 = vector.load %arg9[%c0, %c0_0] : memref<20x20xf32, #tpu.memory_space<vmem>>, vector<20x20xf32>
    %1 = arith.index_cast %arg0 : i32 to index
    %2 = memref.load %arg4[%1] : memref<2xi32, #tpu.memory_space<smem>>
    %3 = arith.index_cast %arg0 : i32 to index
    %4 = memref.load %arg7[%3] : memref<2xi32, #tpu.memory_space<smem>>
    %5 = tpu.iota {dimensions = array<i32: 0>} : vector<20x1xi32>
    %6 = tpu.iota {dimensions = array<i32: 1>} : vector<1x20xi32>
    %7 = tpu.iota {dimensions = array<i32: 1>} : vector<1x8xi32>
    %cst = arith.constant 0.000000e+00 : f32
    %cst_1 = arith.constant 0xFF800000 : f32
    %c0_i32 = arith.constant 0 : i32
    %cst_2 = arith.constant 0.000000e+00 : f32
    %8 = arith.subi %2, %c0_i32 : i32
    %9 = arith.addi %c0_i32, %8 : i32
    %c1_i32 = arith.constant 1 : i32
    %10 = scf.for %arg11 = %c0_i32 to %9 step %c1_i32 iter_args(%arg12 = %cst_2) -> (f32)  : i32 {
      %35 = arith.index_cast %arg0 : i32 to index
      %36 = arith.index_cast %arg11 : i32 to index
      %37 = memref.load %arg1[%35, %36] : memref<2x3xi32, #tpu.memory_space<smem>>
      %38 = arith.index_cast %arg0 : i32 to index
      %39 = arith.index_cast %arg11 : i32 to index
      %40 = memref.load %arg2[%38, %39] : memref<2x3xi32, #tpu.memory_space<smem>>
      %41 = arith.index_cast %arg0 : i32 to index
      %42 = arith.index_cast %arg11 : i32 to index
      %43 = memref.load %arg3[%41, %42] : memref<2x3xi32, #tpu.memory_space<smem>>
      %c0_11 = arith.constant 0 : index
      %44 = arith.index_cast %37 : i32 to index
      %c0_12 = arith.constant 0 : index
      %45 = vector.load %arg8[%c0_11, %44, %c0_12] : memref<1x64x8xf32, #tpu.memory_space<vmem>>, vector<1x20x8xf32>
      %46 = vector.shape_cast %45 : vector<1x20x8xf32> to vector<20x8xf32>
      %47 = vector.broadcast %43 : i32 to vector<1x8xi32>
      %48 = arith.cmpi eq, %7, %47 : vector<1x8xi32>
      %49 = vector.shape_cast %48 : vector<1x8xi1> to vector<1x8xi1>
      %50 = vector.broadcast %49 : vector<1x8xi1> to vector<20x8xi1>
      %51 = vector.broadcast %cst : f32 to vector<20x8xf32>
      %52 = arith.select %50, %46, %51 : vector<20x8xi1>, vector<20x8xf32>
      %cst_13 = arith.constant dense<0.000000e+00> : vector<20xf32>
      %53 = vector.multi_reduction <add>, %52, %cst_13 [1] : vector<20x8xf32> to vector<20xf32>
      %54 = vector.shape_cast %53 : vector<20xf32> to vector<20x1xf32>
      %55 = vector.broadcast %40 : i32 to vector<20x1xi32>
      %56 = arith.cmpi slt, %5, %55 : vector<20x1xi32>
      %57 = vector.broadcast %cst : f32 to vector<20x1xf32>
      %58 = arith.select %56, %54, %57 : vector<20x1xi1>, vector<20x1xf32>
      %59 = vector.broadcast %58 : vector<20x1xf32> to vector<20x20xf32>
      %60 = arith.mulf %0, %59 : vector<20x20xf32>
      %cst_14 = arith.constant dense<0.000000e+00> : vector<20xf32>
      %61 = vector.multi_reduction <add>, %60, %cst_14 [0] : vector<20x20xf32> to vector<20xf32>
      %62 = vector.shape_cast %61 : vector<20xf32> to vector<1x20xf32>
      %63 = vector.broadcast %40 : i32 to vector<1x20xi32>
      %64 = arith.cmpi slt, %6, %63 : vector<1x20xi32>
      %65 = vector.broadcast %cst_1 : f32 to vector<1x20xf32>
      %66 = arith.select %64, %62, %65 : vector<1x20xi1>, vector<1x20xf32>
      %67 = vector.shape_cast %66 : vector<1x20xf32> to vector<1x1x20xf32>
      %cst_15 = arith.constant dense<0xFF800000> : vector<1xf32>
      %68 = vector.multi_reduction <maximumf>, %67, %cst_15 [1, 2] : vector<1x1x20xf32> to vector<1xf32>
      %69 = vector.shape_cast %68 : vector<1xf32> to vector<1x1x1xf32>
      %70 = vector.extract %69[0, 0, 0] : f32 from vector<1x1x1xf32>
      %c0_i32_16 = arith.constant 0 : i32
      %71 = arith.cmpi sgt, %40, %c0_i32_16 : i32
      %cst_17 = arith.constant 0.000000e+00 : f32
      %72 = arith.subf %cst_17, %70 : f32
      %73 = arith.select %71, %72, %cst : f32
      %74 = arith.addf %arg12, %73 : f32
      scf.yield %74 : f32
    }
    %c0_3 = arith.constant 0 : index
    %c0_4 = arith.constant 0 : index
    %c0_5 = arith.constant 0 : index
    %11 = vector.load %arg8[%c0_3, %c0_4, %c0_5] : memref<1x64x8xf32, #tpu.memory_space<vmem>>, vector<1x64x1xf32>
    %12 = vector.shape_cast %11 : vector<1x64x1xf32> to vector<64x1xf32>
    %13 = tpu.iota {dimensions = array<i32: 0>} : vector<64x1xi32>
    %14 = arith.index_cast %arg0 : i32 to index
    %15 = memref.load %arg5[%14] : memref<2xi32, #tpu.memory_space<smem>>
    %16 = arith.index_cast %arg0 : i32 to index
    %17 = memref.load %arg6[%16] : memref<2xi32, #tpu.memory_space<smem>>
    %18 = vector.broadcast %15 : i32 to vector<64x1xi32>
    %19 = arith.cmpi slt, %13, %18 : vector<64x1xi32>
    %20 = vector.broadcast %17 : i32 to vector<64x1xi32>
    %21 = arith.cmpi sge, %13, %20 : vector<64x1xi32>
    %22 = vector.broadcast %4 : i32 to vector<64x1xi32>
    %23 = arith.cmpi slt, %13, %22 : vector<64x1xi32>
    %24 = arith.andi %21, %23 : vector<64x1xi1>
    %25 = arith.ori %19, %24 : vector<64x1xi1>
    %cst_6 = arith.constant 0.000000e+00 : f32
    %26 = vector.broadcast %cst_6 : f32 to vector<64x1xf32>
    %27 = arith.select %25, %12, %26 : vector<64x1xi1>, vector<64x1xf32>
    %28 = vector.shape_cast %27 : vector<64x1xf32> to vector<1x64x1xf32>
    %cst_7 = arith.constant dense<0.000000e+00> : vector<1xf32>
    %29 = vector.multi_reduction <add>, %28, %cst_7 [1, 2] : vector<1x64x1xf32> to vector<1xf32>
    %30 = vector.shape_cast %29 : vector<1xf32> to vector<1x1x1xf32>
    %31 = vector.extract %30[0, 0, 0] : f32 from vector<1x1x1xf32>
    %32 = arith.subf %10, %31 : f32
    %33 = vector.broadcast %32 : f32 to vector<1x8x128xf32>
    %c0_8 = arith.constant 0 : index
    %c0_9 = arith.constant 0 : index
    %c0_10 = arith.constant 0 : index
    %34 = vector.load %arg10[%c0_8, %c0_9, %c0_10] : memref<1x8x128xf32, #tpu.memory_space<vmem>>, vector<1x8x128xf32>
    tpu.vector_store %arg10[%c0_8, %c0_9, %c0_10], %33 {strides = array<i32>} : memref<1x8x128xf32, #tpu.memory_space<vmem>>, vector<1x8x128xf32>,
    return
  }
  func.func @transform_0(%arg0: i32, %arg1: memref<2x3xi32, #tpu.memory_space<smem>>, %arg2: memref<2x3xi32, #tpu.memory_space<smem>>, %arg3: memref<2x3xi32, #tpu.memory_space<smem>>, %arg4: memref<2xi32, #tpu.memory_space<smem>>, %arg5: memref<2xi32, #tpu.memory_space<smem>>, %arg6: memref<2xi32, #tpu.memory_space<smem>>, %arg7: memref<2xi32, #tpu.memory_space<smem>>) -> (i32, i32, i32) {
    %c0_i32 = arith.constant 0 : i32
    %c0_i32_0 = arith.constant 0 : i32
    %c0_i32_1 = arith.constant 0 : i32
    return %arg0, %c0_i32, %c0_i32_0 : i32, i32, i32
  }
  func.func @transform_1(%arg0: i32, %arg1: memref<2x3xi32, #tpu.memory_space<smem>>, %arg2: memref<2x3xi32, #tpu.memory_space<smem>>, %arg3: memref<2x3xi32, #tpu.memory_space<smem>>, %arg4: memref<2xi32, #tpu.memory_space<smem>>, %arg5: memref<2xi32, #tpu.memory_space<smem>>, %arg6: memref<2xi32, #tpu.memory_space<smem>>, %arg7: memref<2xi32, #tpu.memory_space<smem>>) -> (i32, i32) {
    %c0_i32 = arith.constant 0 : i32
    %c0_i32_0 = arith.constant 0 : i32
    %c0_i32_1 = arith.constant 0 : i32
    return %c0_i32, %c0_i32_0 : i32, i32
  }
  func.func @transform_2(%arg0: i32, %arg1: memref<2x3xi32, #tpu.memory_space<smem>>, %arg2: memref<2x3xi32, #tpu.memory_space<smem>>, %arg3: memref<2x3xi32, #tpu.memory_space<smem>>, %arg4: memref<2xi32, #tpu.memory_space<smem>>, %arg5: memref<2xi32, #tpu.memory_space<smem>>, %arg6: memref<2xi32, #tpu.memory_space<smem>>, %arg7: memref<2xi32, #tpu.memory_space<smem>>) -> (i32, i32, i32) {
    %c0_i32 = arith.constant 0 : i32
    %c0_i32_0 = arith.constant 0 : i32
    %c0_i32_1 = arith.constant 0 : i32
    return %arg0, %c0_i32, %c0_i32_0 : i32, i32, i32
  }
}

</mosaic_0001>

<bundles_post_ra>
// kernel: tpu_custom_call.1
= control target key start
LH: loop header
LB: loop body
LE: loop exit
PB: predicated region body
PF: predicated region fallthrough
CT: control target
= control target key end

     0   :  { %s1050_s0 = inlined_call_operand.vmem [shape: s32[2,3], index: 0, kind: input, shape index: {}]   ;;  %s1051_s7 = inlined_call_operand.vmem [shape: f32[2,64,8], index: 7, kind: input, shape index: {}]   ;;  %s1052_s8 = inlined_call_operand.vmem [shape: f32[20,20], index: 8, kind: input, shape index: {}]   ;;  %s1053_s9 = inlined_call_operand.hbm [shape: f32[2,8,128], index: 9, kind: output, shape index: {}]   ;;  %s1054_s1 = inlined_call_operand.vmem [shape: s32[2,3], index: 1, kind: input, shape index: {}]   ;;  %s1055_s2 = inlined_call_operand.vmem [shape: s32[2,3], index: 2, kind: input, shape index: {}]   ;;  %s1056_s3 = inlined_call_operand.vmem [shape: s32[2], index: 3, kind: input, shape index: {}]   ;;  %s1057_s4 = inlined_call_operand.vmem [shape: s32[2], index: 4, kind: input, shape index: {}]   ;;  %s1058_s5 = inlined_call_operand.vmem [shape: s32[2], index: 5, kind: input, shape index: {}]   ;;  %s1059_s6 = inlined_call_operand.vmem [shape: s32[2], index: 6, kind: input, shape index: {}]  }
   0x1   :  { %s14_s11 = sshll.u32 %s1050_s0, 4  ;;  %s18_s14 = sshll.u32 %s1054_s1, 4  ;;  %s15_s11 = int_to_ptr.vmem [resolvable:$true] %s14_s11  ;;  %s19_s14 = int_to_ptr.vmem [resolvable:$true] %s18_s14 }
   0x2   :  { %s526_s15 = scalar_lea.vmem %s15_s11, 32  ;;  %p531_p1 = scmp.lt.s32.totalorder %s15_s11, %s15_s11 }
   0x3   :  { %p527_p0 = scmp.ne.s32.totalorder %s15_s11, %s526_s15  ;;  %p532_p2 = scmp.lt.s32.totalorder %s526_s15, %s526_s15 }
   0x5   :  { %p533_p3 = por %p532_p2, %p531_p1 }
   0x7   :  { %p534_p4 = pnand %p533_p3, %p527_p0 }
   0x9   :  { %537 = shalt.err (!%p534_p4)  }
   0xa   :  { %s700_s16 = smov [#allocation3]   ;;  %s538_s17 = scalar_lea.vmem %s19_s14, 32 }
   0xb   :  { %17 = dma.vmem_to_smem %s15_s11, 32, %s700_s16, [#allocation2] }
   0xc   :  { %p539_p5 = scmp.ne.s32.totalorder %s19_s14, %s538_s17  ;;  %p543_p6 = scmp.lt.s32.totalorder %s19_s14, %s19_s14 }
   0xd   :  { %p544_p7 = scmp.lt.s32.totalorder %s538_s17, %s538_s17 }
   0xf   :  { %p545_p8 = por %p544_p7, %p543_p6 }
  0x11   :  { %p546_p9 = pnand %p545_p8, %p539_p5 }
  0x13   :  { %549 = shalt.err (!%p546_p9)  }
  0x14   :  { %s701_s0 = smov [#allocation4]   ;;  %s22_s19 = sshll.u32 %s1055_s2, 4  ;;  %s23_s19 = int_to_ptr.vmem [resolvable:$true] %s22_s19 }
  0x15   :  { %21 = dma.vmem_to_smem %s19_s14, 32, %s701_s0, [#allocation2] }
  0x16   :  { %s26_s22 = sshll.u32 %s1056_s3, 4  ;;  %s550_s23 = scalar_lea.vmem %s23_s19, 32  ;;  %s27_s22 = int_to_ptr.vmem [resolvable:$true] %s26_s22 }
  0x17   :  { %p551_p10 = scmp.ne.s32.totalorder %s23_s19, %s550_s23  ;;  %p555_p11 = scmp.lt.s32.totalorder %s23_s19, %s23_s19 }
  0x18   :  { %p556_p12 = scmp.lt.s32.totalorder %s550_s23, %s550_s23 }
  0x1a   :  { %p557_p13 = por %p556_p12, %p555_p11 }
  0x1c   :  { %p558_p0 = pnand %p557_p13, %p551_p10 }
  0x1e   :  { %561 = shalt.err (!%p558_p0)  }
  0x1f   :  { %s702_s24 = smov [#allocation5]   ;;  %s562_s25 = scalar_lea.vmem %s27_s22, 16 }
  0x20   :  { %25 = dma.vmem_to_smem %s23_s19, 32, %s702_s24, [#allocation2] }
  0x21   :  { %p563_p1 = scmp.ne.s32.totalorder %s27_s22, %s562_s25  ;;  %p567_p2 = scmp.lt.s32.totalorder %s27_s22, %s27_s22 }
  0x22   :  { %p568_p3 = scmp.lt.s32.totalorder %s562_s25, %s562_s25 }
  0x24   :  { %p569_p4 = por %p568_p3, %p567_p2 }
  0x26   :  { %p570_p5 = pnand %p569_p4, %p563_p1 }
  0x28   :  { %573 = shalt.err (!%p570_p5)  }
  0x29   :  { %s703_s2 = smov [#allocation6]   ;;  %s30_s27 = sshll.u32 %s1057_s4, 4  ;;  %s31_s27 = int_to_ptr.vmem [resolvable:$true] %s30_s27 }
  0x2a   :  { %29 = dma.vmem_to_smem %s27_s22, 16, %s703_s2, [#allocation2] }
  0x2b   :  { %s34_s30 = sshll.u32 %s1058_s5, 4  ;;  %s574_s10 = scalar_lea.vmem %s31_s27, 16  ;;  %s35_s30 = int_to_ptr.vmem [resolvable:$true] %s34_s30 }
  0x2c   :  { %p575_p6 = scmp.ne.s32.totalorder %s31_s27, %s574_s10  ;;  %p579_p7 = scmp.lt.s32.totalorder %s31_s27, %s31_s27 }
  0x2d   :  { %p580_p8 = scmp.lt.s32.totalorder %s574_s10, %s574_s10 }
  0x2f   :  { %p581_p9 = por %p580_p8, %p579_p7 }
  0x31   :  { %p582_p10 = pnand %p581_p9, %p575_p6 }
  0x33   :  { %585 = shalt.err (!%p582_p10)  }
  0x34   :  { %s704_s11 = smov [#allocation7]   ;;  %s586_s12 = scalar_lea.vmem %s35_s30, 16 }
  0x35   :  { %33 = dma.vmem_to_smem %s31_s27, 16, %s704_s11, [#allocation2] }
  0x36   :  { %p587_p11 = scmp.ne.s32.totalorder %s35_s30, %s586_s12  ;;  %p591_p12 = scmp.lt.s32.totalorder %s35_s30, %s35_s30 }
  0x37   :  { %p592_p13 = scmp.lt.s32.totalorder %s586_s12, %s586_s12 }
  0x39   :  { %p593_p0 = por %p592_p13, %p591_p12 }
  0x3b   :  { %p594_p1 = pnand %p593_p0, %p587_p11 }
  0x3d   :  { %597 = shalt.err (!%p594_p1)  }
  0x3e   :  { %s705_s4 = smov [#allocation8]   ;;  %s38_s14 = sshll.u32 %s1059_s6, 4  ;;  %s39_s14 = int_to_ptr.vmem [resolvable:$true] %s38_s14 }
  0x3f   :  { %37 = dma.vmem_to_smem %s35_s30, 16, %s705_s4, [#allocation2] }
  0x40   :  { %s598_s15 = scalar_lea.vmem %s39_s14, 16  ;;  %p603_p3 = scmp.lt.s32.totalorder %s39_s14, %s39_s14 }
  0x41   :  { %p599_p2 = scmp.ne.s32.totalorder %s39_s14, %s598_s15  ;;  %p604_p4 = scmp.lt.s32.totalorder %s598_s15, %s598_s15 }
  0x43   :  { %p605_p5 = por %p604_p4, %p603_p3 }
  0x45   :  { %p606_p6 = pnand %p605_p5, %p599_p2 }
  0x47   :  { %609 = shalt.err (!%p606_p6)  }
  0x48   :  { %s706_s16 = smov [#allocation9]  }
  0x49   :  { %41 = dma.vmem_to_smem %s39_s14, 16, %s706_s16, [#allocation2] }
  0x4a   :  { %666 = dma.done.wait [#allocation2], 160 }
  0x4b   :  { %667 = vsyncadd [#allocation2], 4294967136 }
  0x4c   :  { %43 = sfence }
  0x4d   :  { %44 = vsyncpa [#allocation11], 0 }
  0x4e   :  { %46 = vsyncpa [#allocation11 + $0x1], 0  ;;  %s779_s17 = smov 0   ;;  %s781_s0 = smov 0  }
  0x4f   :  { %s783_s6 = smov 0   ;;  %s785_s1 = smov 0  }
  0x50 LB: > { %s800_s18 = sadd.s32 4294967295, %s686_s1   ;;  %s438_s19 = sadd.s32 4294967294, %s686_s1   ;;  %s686_s1 = sphi %s785_s1, %s1088_s1   ;;  %s682_s6 = sphi %s783_s6, %s1087_s6   ;;  %s678_s0 = sphi %s781_s0, %s1086_s0   ;;  %s674_s17 = sphi %s779_s17, %s1085_s17  }
  0x51   : > { %s804_s20 = sadd.s32 1, %s686_s1   ;;  %s106_s21 = sadd.s32 1, %s682_s6 }
  0x52   : > { %s103_s22 = ssub.s32 %s686_s1, %s804_s20  ;;  %p116_p7 = scmp.ne.s32.totalorder %s682_s6, %s678_s0 }
  0x53   : > { %p104_p8 = scmp.eq.s32.totalorder %s103_s22, 0  ;;  %p117_p9 = scmp.eq.s32.totalorder %s800_s18, 1 }
  0x54   : > { %p122_p10 = scmp.ne.s32.totalorder %s678_s0, %s674_s17  ;;  %p123_p11 = scmp.eq.s32.totalorder %s438_s19, 1 }
  0x55   : > { %s815_s23 = scalar_select %p104_p8, %s682_s6, %s106_s21  }
  0x56   : > { %p817_p12 = por %p117_p9, %p116_p7  ;;  %p821_p13 = por %p123_p11, %p122_p10 }
  0x57   : > { %p441_p0 = scmp.ge.s32.totalorder %s686_s1, 1  ;;  %p152_p1 = scmp.lt.s32.totalorder %s686_s1, 3 }
  0x59   : > { %p153_p2 = pnand %p441_p0, %p152_p1 }
  0x5a   : > { %s171_s2 = sand.u32 (!%p153_p2), 1, %s678_s0   ;;  %p174_p3 = scmp.lt.s32.totalorder (!%p153_p2), %s800_s18, 1  ;;  %v832_v0 = vld [vmem:[%s1052_s8] sm:$0xff] (!%p153_p2)  ;;  %v837_v1 = vld [vmem:[%s1052_s8 + $0x8] sm:$0xff] (!%p153_p2)  ;;  %v842_v2 = vld [vmem:[%s1052_s8 + $0x10] sm:$0xf] (!%p153_p2)  ;;  %v184_v3 = vlaneseq (!%p153_p2) }
  0x5b   : > { %156 = sbr.rel (%p153_p2) target bundleno = 744 (0x2e8), region = 28  ;;  %s846_s10 = sshll.u32 (!%p153_p2), %s171_s2, 3 }
  0x5c   : > { %s849_s11 = sld [smem:[#allocation6 + %s800_s18]] (!%p153_p2)  ;;  %v854_v4 = vshrl.u32 (!%p153_p2), %v184_v3, 7  ;;  %v856_v5 = vand.u32 (!%p153_p2), 127, %v184_v3  ;;  %s173_s16 = scalar_lea.vmem (!%p153_p2), [#allocation10], %s846_s10 }
  0x5d   : > { %s852_s12 = sld [smem:[#allocation9 + %s800_s18]] (!%p153_p2)  ;;  %s872_s19 = smov (!%p153_p2), 0.0  }
  0x5e   : > { %v860_v6 = vadd.s32 (!%p153_p2), 8, %v854_v4  ;;  %v863_v7 = vadd.s32 (!%p153_p2), 16, %v854_v4 }
  0x62   : > { %s175_s4 = scalar_select %p174_p3, %s800_s18, 1 }
  0x63   : > { %p445_p4 = scmp.le.s32.totalorder %s849_s11, 0 }
  0x64   : > { %s451_s5 = sshll.u32 %s175_s4, 6  ;;  %s874_s21 = smov (!%p445_p4), 0.0  }
  0x65   : > { %s868_s15 = scalar_lea.vmem %s1051_s7, %s451_s5  ;;  %412 = sbr.rel (%p445_p4) target bundleno = 489 (0x1e9), region = 65 }
  0x66   : > { %s876_s22 = smov (!%p445_p4), 0  }
  0x6c LB: >> { %s197_s3 = sshra.s32 %s694_s22, 7  ;;  %s202_s26 = sand.u32 127, %s694_s22  ;;  %vm218_vm0 = vcmask 64512   ;;  %vm225_vm1 = vcmask 60416   ;;  %vm239_vm6 = vcmask 162816   ;;  %vm243_vm7 = vcmask 158720   ;;  %s694_s22 = sphi %s876_s22, %s193_s22   ;;  %s690_s21 = sphi %s874_s21, %s1062_s21  }
  0x6d   : >> { %s199_s27 = sadd.s32 %s800_s18, %s197_s3  ;;  %s193_s22 = sadd.s32 1, %s694_s22  }
  0x6e   : >> { %s446_s28 = sshll.u32 %s199_s27, 7  ;;  %p192_p6 = scmp.ge.s32.totalorder %s193_s22, %s849_s11 }
  0x6f   : >> { %s203_s29 = sadd.s32 %s446_s28, %s202_s26 }
  0x70   : >> { %s204_s30 = sld [smem:[#allocation3 + %s203_s29]] }
  0x71   : >> { %s206_s4 = sld [smem:[#allocation5 + %s203_s29]] }
  0x72   : >> { %s889_s13 = sld [smem:[#allocation4 + %s203_s29]] }
  0x76   : >> { %s207_s5 = scalar_lea.vmem %s868_s15, %s204_s30 }
  0x77   : >> { %v208_v8 = vld [vmem:[%s207_s5] sm:$0xff]  ;;  %v211_v9 = vstv %s206_s4  ;;  %v209_v10 = vld [vmem:[%s207_s5 + $0x8] sm:$0xff]  ;;  %v210_v11 = vld [vmem:[%s207_s5 + $0x10] sm:$0xf] }
  0x78   : >> { %vm212_vm2 = vcmp.eq.s32.totalorder %v856_v5, %v211_v9  ;;  %v229_v18 = vstv %s889_s13  ;;  %p258_p5 = scmp.gt.s32.totalorder %s889_s13, 0 }
  0x79   : >> { %v215_v12 = vsel %vm212_vm2, %v208_v8, 0.0  ;;  %v216_v13 = vsel %vm212_vm2, %v209_v10, 0.0  ;;  %v217_v14 = vsel %vm212_vm2, %v210_v11, 0.0  ;;  %vm230_vm3 = vcmp.lt.s32.totalorder %v854_v4, %v229_v18 }
  0x7a   : >> { %v219_v15 = vsel %vm218_vm0, %v215_v12, 0.0  ;;  %v226_v16 = vsel %vm225_vm1, %v217_v14, 0.0  ;;  %v222_v17 = vsel %vm218_vm0, %v216_v13, 0.0  ;;  %vm232_vm4 = vcmp.lt.s32.totalorder %v863_v7, %v229_v18 }
  0x7b   : >> { %220 = vadd.xlane.f32.xlu0 %v219_v15  ;;  %227 = vadd.xlane.f32.xlu1 %v226_v16  ;;  %vm231_vm5 = vcmp.lt.s32.totalorder %v860_v6, %v229_v18  ;;  %vm252_vm8 = vcmp.lt.s32.totalorder %v856_v5, %v229_v18 }
  0x7f   : >> { %223 = vadd.xlane.f32.xlu0 %v222_v17 }
 0x108   : >> { %v221_v19 = vpop.xlane.xlu0 %220  ;;  %v228_v20 = vpop.xlane.xlu1 %227 }
 0x109   : >> { %v233_v21 = vsel %vm230_vm3, %v221_v19, 0.0  ;;  %v235_v22 = vsel %vm232_vm4, %v228_v20, 0.0 }
 0x10a   : >> { %v236_v23 = vmul.f32 %v233_v21, %v832_v0  ;;  %v238_v25 = vmul.f32 %v235_v22, %v842_v2 }
 0x10c   : >> { %v224_v24 = vpop.xlane.xlu0 %223  ;;  %v240_v28 = vsel %vm239_vm6, %v236_v23, 0.0  ;;  %v244_v30 = vsel %vm243_vm7, %v238_v25, 0.0 }
 0x10d   : >> { %v234_v26 = vsel %vm231_vm5, %v224_v24, 0.0 }
 0x10e   : >> { %v237_v27 = vmul.f32 %v234_v26, %v837_v1 }
 0x110   : >> { %v241_v29 = vsel %vm239_vm6, %v237_v27, 0.0 }
 0x111   : >> { %v242_v31 = vadd.f32 %v241_v29, %v240_v28 }
 0x113   : >> { %v245_v32 = vadd.f32 %v244_v30, %v242_v31 }
 0x115   : >> { %v246_v33 = vrot.slane %v245_v32, 4 }
 0x117   : >> { %v247_v34 = vadd.f32 %v246_v33, %v245_v32 }
 0x119   : >> { %v248_v35 = vrot.slane %v247_v34, 2 }
 0x11b   : >> { %v249_v36 = vadd.f32 %v248_v35, %v247_v34 }
 0x11d   : >> { %v250_v37 = vrot.slane %v249_v36, 1 }
 0x11f   : >> { %v251_v38 = vadd.f32 %v250_v37, %v249_v36 }
 0x121   : >> { %v253_v39 = vsel %vm252_vm8, %v251_v38, -inf }
 0x122   : >> { %v254_v40 = vsel %vm239_vm6, %v253_v39, -inf }
 0x123   : >> { %255 = vmax.xlane.f32.xlu1 %v254_v40 }
 0x1b0   : >> { %v256_v41 = vpop.xlane.xlu1 %255 }
 0x1b1   : >> { %452 = vpush %v256_v41 }
 0x1e2   : >> { %s453_s14 = spop %452  ;;  %195 = sbr.rel (!%p192_p6) target bundleno = 108 (0x6c), region = 71 }
 0x1e3   : >> { %s259_s19 = ssub.f32 0.0, %s453_s14 }
 0x1e5   : >> { %s1090_s19 = smov (!%p258_p5, %s259_s19), 0.0 }
 0x1e6   : >> { %s261_s3 = sadd.f32 %s690_s21, %s1090_s19  }
 0x1e8   : >> { %s1062_s21 = smov %s261_s3  ;;  %s1063_s19 = smov (%p192_p6), %s261_s3 }
 0x1e9 PF: > { %s276_s26 = sld [smem:[#allocation8 + %s800_s18]]  ;;  %v295_v42 = vstv %s852_s12  ;;  %v270_v43 = vadd.s32 24, %v854_v4  ;;  %v271_v44 = vadd.s32 32, %v854_v4  ;;  %v272_v45 = vadd.s32 40, %v854_v4  ;;  %v262_v56 = vld [vmem:[%s868_s15] sm:$0xff]  ;;  %v263_v58 = vld [vmem:[%s868_s15 + $0x8] sm:$0xff]  ;;  %s698_s19 = sphi %s872_s19, %s1063_s19  }
 0x1ea   : > { %s275_s27 = sld [smem:[#allocation7 + %s800_s18]]  ;;  %vm296_vm9 = vcmp.lt.s32.totalorder %v854_v4, %v295_v42  ;;  %v273_v46 = vadd.s32 48, %v854_v4  ;;  %vm297_vm10 = vcmp.lt.s32.totalorder %v860_v6, %v295_v42  ;;  %vm298_vm14 = vcmp.lt.s32.totalorder %v863_v7, %v295_v42  ;;  %v264_v60 = vld [vmem:[%s868_s15 + $0x10] sm:$0xff]  ;;  %v265_v61 = vld [vmem:[%s868_s15 + $0x18] sm:$0xff]  ;;  %v266_v63 = vld [vmem:[%s868_s15 + $0x20] sm:$0xff]  ;;  %s448_s11 = sshll.u32 %s800_s18, 7 }
 0x1eb   : > { %v274_v48 = vadd.s32 56, %v854_v4  ;;  %vm299_vm0 = vcmp.lt.s32.totalorder %v270_v43, %v295_v42  ;;  %v1064_v49 = vmov 0  ;;  %vm300_vm3 = vcmp.lt.s32.totalorder %v271_v44, %v295_v42  ;;  %v267_v2 = vld [vmem:[%s868_s15 + $0x28] sm:$0xff]  ;;  %v268_v8 = vld [vmem:[%s868_s15 + $0x30] sm:$0xff]  ;;  %v269_v13 = vld [vmem:[%s868_s15 + $0x38] sm:$0xff]  ;;  %s370_s12 = sshll.u32 %s173_s16, 4  ;;  %s1004_s29 = scalar_lea.hbm %s1053_s9, %s448_s11  ;;  %s1006_s12 = int_to_ptr.vmem [resolvable:$true] %s370_s12 }
 0x1ec   : > { %v1066_v50 = vmov 0  ;;  %vm301_vm6 = vcmp.lt.s32.totalorder %v272_v45, %v295_v42  ;;  %v1072_v54 = vmov 0  ;;  %v1074_v55 = vmov 0  ;;  %s357_s30 = scalar_lea.sflag [#allocation11], %s171_s2  ;;  %s610_s18 = scalar_lea.vmem %s1006_s12, 128 }
 0x1ed   : > { %v1076_v57 = vmov 0  ;;  %p611_p7 = scmp.ne.s32.totalorder %s1006_s12, %s610_s18  ;;  %s707_s4 = smov [#allocation10]  }
 0x1ee   : > { %s614_s5 = sshll.u32 %s707_s4, 4  ;;  %s615_s5 = int_to_ptr.vmem [resolvable:$false] %s614_s5 }
 0x1ef   : > { %v286_v47 = vstv %s276_s26  ;;  %p612_p8 = pnand %p611_p7, %p817_p12  ;;  %s616_s13 = scalar_lea.vmem %s615_s5, 256 }
 0x1f0   : > { %vm287_vm11 = vcmp.ge.s32.totalorder %v854_v4, %v286_v47  ;;  %vm288_vm12 = vcmp.ge.s32.totalorder %v860_v6, %v286_v47  ;;  %vm289_vm13 = vcmp.ge.s32.totalorder %v863_v7, %v286_v47  ;;  %vm290_vm15 = vcmp.ge.s32.totalorder %v270_v43, %v286_v47  ;;  %p617_p10 = scmp.lt.s32.totalorder %s1006_s12, %s615_s5  ;;  %p618_p11 = scmp.lt.s32.totalorder %s616_s13, %s610_s18 }
 0x1f1   : > { %vm929_vm1 = vmand %vm287_vm11, %vm296_vm9  ;;  %vm291_vm2 = vcmp.ge.s32.totalorder %v271_v44, %v286_v47  ;;  %v277_v51 = vstv %s275_s27  ;;  %vm292_vm5 = vcmp.ge.s32.totalorder %v272_v45, %v286_v47  ;;  %vm293_vm8 = vcmp.ge.s32.totalorder %v273_v46, %v286_v47  ;;  %p613_p9 = pneg %p612_p8 }
 0x1f2   : > { %v1065_v49 = vsel %vm929_vm1, 4294967295, %v1064_v49  ;;  %vm933_vm4 = vmand %vm288_vm12, %vm297_vm10  ;;  %vm302_vm9 = vcmp.lt.s32.totalorder %v273_v46, %v295_v42  ;;  %vm294_vm10 = vcmp.ge.s32.totalorder %v274_v48, %v286_v47  ;;  %vm303_vm12 = vcmp.lt.s32.totalorder %v274_v48, %v295_v42  ;;  %p619_p0 = por %p618_p11, %p617_p10 }
 0x1f3   : > { %v1067_v50 = vsel %vm933_vm4, 4294967295, %v1066_v50  ;;  %vm937_vm7 = vmand %vm289_vm13, %vm298_vm14  ;;  %vm278_vm4 = vcmp.lt.s32.totalorder %v854_v4, %v277_v51  ;;  %vm279_vm14 = vcmp.lt.s32.totalorder %v860_v6, %v277_v51 }
 0x1f4   : > { %vm941_vm11 = vmand %vm290_vm15, %vm299_vm0  ;;  %vm280_vm0 = vcmp.lt.s32.totalorder %v863_v7, %v277_v51  ;;  %p620_p1 = pnand %p619_p0, %p613_p9 }
 0x1f5   : > { %vm945_vm1 = vmand %vm291_vm2, %vm300_vm3  ;;  %vm328_vm3 = vcmask 7168  }
 0x1f6   : > { %v1073_v54 = vsel %vm945_vm1, 4294967295, %v1072_v54  ;;  %vm950_vm13 = vmand %vm292_vm5, %vm301_vm6  ;;  %vm281_vm5 = vcmp.lt.s32.totalorder %v270_v43, %v277_v51  ;;  %vm1080_vm6 = vnez %v1065_v49  ;;  %vm282_vm1 = vcmp.lt.s32.totalorder %v271_v44, %v277_v51 }
 0x1f7   : > { %v1075_v55 = vsel %vm950_vm13, 4294967295, %v1074_v55  ;;  %vm956_vm15 = vmand %vm293_vm8, %vm302_vm9  ;;  %vm1081_vm8 = vnez %v1067_v50 }
 0x1f8   : > { %v1077_v57 = vsel %vm956_vm15, 4294967295, %v1076_v57  ;;  %vm962_vm2 = vmand %vm294_vm10, %vm303_vm12  ;;  %vm283_vm15 = vcmp.lt.s32.totalorder %v272_v45, %v277_v51  ;;  %vm284_vm12 = vcmp.lt.s32.totalorder %v273_v46, %v277_v51 }
 0x1f9   : > { %vm312_vm13 = vmor %vm278_vm4, %vm1080_vm6 }
 0x1fa   : > { %vm313_vm9 = vmor %vm279_vm14, %vm1081_vm8  ;;  %v320_v62 = vsel %vm312_vm13, %v262_v56, 0.0  ;;  %vm285_vm14 = vcmp.lt.s32.totalorder %v274_v48, %v277_v51  ;;  %vm1082_vm13 = vnez %v1073_v54 }
 0x1fb   : > { %vm314_vm10 = vmor %vm280_vm0, %vm937_vm7  ;;  %v321_v0 = vsel %vm313_vm9, %v263_v58, 0.0  ;;  %v329_v1 = vsel %vm328_vm3, %v320_v62, 0.0  ;;  %vm1083_vm7 = vnez %v1075_v55 }
 0x1fc   : > { %vm315_vm4 = vmor %vm281_vm5, %vm941_vm11  ;;  %v322_v3 = vsel %vm314_vm10, %v264_v60, 0.0  ;;  %v330_v4 = vsel %vm328_vm3, %v321_v0, 0.0  ;;  %vm1084_vm11 = vnez %v1077_v57 }
 0x1fd   : > { %vm316_vm6 = vmor %vm282_vm1, %vm1082_vm13  ;;  %v323_v5 = vsel %vm315_vm4, %v265_v61, 0.0  ;;  %v331_v6 = vadd.f32 %v330_v4, %v329_v1  ;;  %v332_v7 = vsel %vm328_vm3, %v322_v3, 0.0 }
 0x1fe   : > { %vm317_vm0 = vmor %vm283_vm15, %vm1083_vm7  ;;  %v324_v9 = vsel %vm316_vm6, %v266_v63, 0.0  ;;  %v334_v10 = vsel %vm328_vm3, %v323_v5, 0.0 }
 0x1ff   : > { %vm318_vm5 = vmor %vm284_vm12, %vm1084_vm11  ;;  %v325_v11 = vsel %vm317_vm0, %v267_v2, 0.0  ;;  %v333_v12 = vadd.f32 %v332_v7, %v331_v6  ;;  %v336_v14 = vsel %vm328_vm3, %v324_v9, 0.0 }
 0x200   : > { %vm319_vm1 = vmor %vm285_vm14, %vm962_vm2  ;;  %v326_v15 = vsel %vm318_vm5, %v268_v8, 0.0  ;;  %v338_v17 = vsel %vm328_vm3, %v325_v11, 0.0 }
 0x201   : > { %v335_v16 = vadd.f32 %v334_v10, %v333_v12  ;;  %v327_v18 = vsel %vm319_vm1, %v269_v13, 0.0  ;;  %v340_v20 = vsel %vm328_vm3, %v326_v15, 0.0 }
 0x202   : > { %v342_v22 = vsel %vm328_vm3, %v327_v18, 0.0 }
 0x203   : > { %v337_v19 = vadd.f32 %v336_v14, %v335_v16 }
 0x205   : > { %v339_v21 = vadd.f32 %v338_v17, %v337_v19 }
 0x207   : > { %v341_v23 = vadd.f32 %v340_v20, %v339_v21 }
 0x209   : > { %v343_v24 = vadd.f32 %v342_v22, %v341_v23 }
 0x20b   : > { %344 = vadd.xlane.f32.xlu0 %v343_v24 }
 0x298   : > { %v345_v25 = vpop.xlane.xlu0 %344 }
 0x299   : > { %v346_v26 = vrot.slane %v345_v25, 4 }
 0x29b   : > { %v347_v27 = vadd.f32 %v346_v26, %v345_v25 }
 0x29d   : > { %v348_v28 = vrot.slane %v347_v27, 2 }
 0x29f   : > { %v349_v29 = vadd.f32 %v348_v28, %v347_v27 }
 0x2a1   : > { %v350_v30 = vrot.slane %v349_v29, 1 }
 0x2a3   : > { %v351_v31 = vadd.f32 %v350_v30, %v349_v29 }
 0x2a5   : > { %454 = vpush %v351_v31 }
 0x2d6   : > { %s455_s15 = spop %454 }
 0x2d7   : > { %s353_s21 = ssub.f32 %s698_s19, %s455_s15 }
 0x2d9   : > { %v354_v32 = vstv %s353_s21 }
 0x2da   : > { %355 = vst [vmem:[%s173_s16] sm:$0xff] %v354_v32 }
 0x2db   : > { %623 = shalt.err (!%p620_p1)
}
 0x2dc   : > { %s624_s2 = scalar_lea.hbm %s1004_s29, 128  ;;  %s628_s14 = scalar_lea.hbm %s1053_s9, 256 }
 0x2dd   : > { %p625_p2 = scmp.ne.s32.totalorder %s1004_s29, %s624_s2  ;;  %p629_p5 = scmp.lt.u32.totalorder %s1004_s29, %s1053_s9 }
 0x2de   : > { %p630_p6 = scmp.lt.u32.totalorder %s628_s14, %s624_s2  ;;  %p632_p8 = scmp.lt.u32.totalorder %s624_s2, %s1004_s29 }
 0x2df   : > { %p626_p3 = pnand %p625_p2, %p817_p12 }
 0x2e0   : > { %p631_p7 = por %p630_p6, %p629_p5 }
 0x2e1   : > { %p627_p4 = pneg %p626_p3 }
 0x2e2   : > { %p633_p9 = por %p632_p8, %p631_p7 }
 0x2e4   : > { %p634_p10 = pnand %p633_p9, %p627_p4 }
 0x2e6   : > { %637 = shalt.err (!%p634_p10)
}
 0x2e7   : > { %456 = dma.vmem_to_hbm [thread:$0]  (%p817_p12), %s1006_s12, 128, %s1004_s29, %s357_s30  }
 0x2e8 PF: > { %p462_p11 = scmp.ge.s32.totalorder %s686_s1, 2  ;;  %s382_s26 = sand.u32 1, %s674_s17  }
 0x2e9   : > { %s383_s27 = scalar_lea.sflag [#allocation11], %s382_s26 }
 0x2ea   : > { %p459_p0 = pnand %p462_p11, %p821_p13 }
 0x2ec   : > { %669 = dma.done.wait (!%p459_p0), %s383_s27, 128  }
 0x2ed   : > { %671 = vsyncadd (!%p459_p0), %s383_s27, 4294967168  ;;  %p49_p1 = scmp.ge.s32.totalorder %s804_s20, 4   ;;  %s1085_s17 = smov %s678_s0 }
 0x2ee   : > { %s1086_s0 = smov %s682_s6  ;;  %s1087_s6 = smov %s815_s23 }
 0x2ef   : > { %s1088_s1 = smov %s804_s20  ;;  %51 = sbr.rel (!%p49_p1) target bundleno = 80 (0x50), region = 82 }
 0x2f6   :  { %388 = vsyncpa [#allocation11], 1 }
 0x2f7   :  { %390 = vsyncpa [#allocation11 + $0x1], 1 }

</bundles_post_ra>
